<compile_context>
chip_gen: v5e
topology: v5e:2x2
jax: 0.10.0
libtpu: 0.0.40
codegen_flags: <defaults>
</compile_context>

<pallas_src>
import jax
import jax.numpy as jnp
from jax.experimental import pallas as pl
from jax.experimental.pallas import tpu as pltpu


def _round_up(x, m):
    return ((x + m - 1) // m) * m


def _vmem_budget():
    """~3/4 of physical VMEM per core (headroom for Mosaic internal scratch)."""
    cap = 64 << 20                      # conservative default: v7x per-TC VMEM
    try:
        info = pltpu.get_tpu_info()
        cap = int(getattr(info, "vmem_capacity_bytes", cap)) or cap
    except Exception:
        pass
    return (cap * 3) // 4


def _choose_tiles(D, F, isz, wsz, budget, row_cap):
    """Pick (tile_rows, tile_f) under the VMEM budget."""

    def vmem_need(tm, tf):
        return ((4 * tm * D * isz)              # x + out blocks, double-buffered
                + tm * D * 4                    # f32 accumulator scratch
                + tm * tf * (4 + wsz)           # h intermediate (f32) + recast
                + 2 * (2 * D + 1) * tf * wsz    # W1 / W2 / b1 blocks, double-buffered
                + 6 * D * wsz)                  # b2 / gamma / beta blocks

    def fits(tm, tf):
        return (vmem_need(tm, tf) * 5) // 4 <= budget   # ~25% compiler-temp margin

    tms = sorted({t for t in (512, 384, 256, 192, 128, 96, 64, 32, 16, 8, row_cap)
                  if 8 <= t <= row_cap}, reverse=True)

    # 1) Weights-resident path: single reduction step; W1/W2 are DMA'd once
    #    (constant index map along the row axis) and stay resident in VMEM.
    for tm in tms:
        if tm < min(128, row_cap):
            break
        if fits(tm, F):
            return tm, F

    # 2) Streamed path: hidden dim tiled in multiples of 128 and re-streamed
    #    per row tile.  Keep tile_rows large (intensity on streamed weights
    #    scales with tile_rows); shrink tile_f first when something must give.
    tfs = [t for t in (2048, 1536, 1024, 768, 512, 384, 256, 128)
           if t <= _round_up(F, 128)]
    if not tfs:
        tfs = [128]
    for tm in tms:
        ok = [tf for tf in tfs if fits(tm, tf)]
        if not ok:
            continue
        good = [tf for tf in ok if _round_up(F, tf) - F <= F // 8]
        return tm, (good[0] if good else ok[0])

    # 3) Last resort: minimal tiles (pathological D; compiler reports overflow
    #    rather than miscomputing).
    return 8, 128


def ffn_block_kernel(x_ref, w1_ref, b1_ref, w2_ref, b2_ref,
                     gamma_ref, beta_ref, o_ref, acc_ref):
    """One (row-tile, F-tile) step of LayerNorm(x + MLP(x))."""
    k = pl.program_id(1)

    @pl.when(k == 0)
    def _init():
        acc_ref[...] = jnp.zeros_like(acc_ref)

    x = x_ref[...]                                      # (TM, D), native dtype

    # ---- Linear1 slice -> bias -> ReLU (MXU native dtype, f32 accumulation) --
    h = jnp.dot(x, w1_ref[...], preferred_element_type=jnp.float32)
    h = jnp.maximum(h + b1_ref[...].astype(jnp.float32), 0.0)
    # TODO(synk): training-mode dropout not reproduced (identity / eval mode).

    # ---- Linear2 slice contribution, accumulated in f32 ----
    acc_ref[...] += jnp.dot(h.astype(w2_ref.dtype), w2_ref[...],
                            preferred_element_type=jnp.float32)

    # ---- Epilogue on last F-tile: bias2, residual, LayerNorm (f32) ----
    @pl.when(k == pl.num_programs(1) - 1)
    def _finalize():
        inv_d = 1.0 / x_ref.shape[-1]
        y = acc_ref[...] + b2_ref[...].astype(jnp.float32)
        z = x.astype(jnp.float32) + y
        # Single-pass mean / variance: var = E[z^2] - E[z]^2 (one XLU pass saved).
        mean = jnp.sum(z, axis=-1, keepdims=True) * inv_d
        var = jnp.sum(z * z, axis=-1, keepdims=True) * inv_d - mean * mean
        var = jnp.maximum(var, 0.0)
        inv = jax.lax.rsqrt(var + 1e-5)
        out = (z - mean) * inv * gamma_ref[...].astype(jnp.float32) \
              + beta_ref[...].astype(jnp.float32)
        o_ref[...] = out.astype(o_ref.dtype)


def feed_forward_block(x, w1, b1, w2, b2, gamma, beta, *,
                       tile_rows=None, tile_f=None):
    """x: (B, S, D).  w1: (D, F), b1: (F,), w2: (F, D), b2: (D,),
    gamma/beta: (D,).  Returns (B, S, D)."""
    B, S, D = x.shape
    F = w1.shape[1]
    rows = B * S
    isz = jnp.dtype(x.dtype).itemsize
    wsz = jnp.dtype(w1.dtype).itemsize

    budget = _vmem_budget()

    rows8 = _round_up(rows, 8)
    row_cap = max(8, _round_up(
        min(int(tile_rows) if tile_rows is not None else 512, rows8), 8))

    if tile_f is None or tile_rows is None:
        auto_tm, auto_tf = _choose_tiles(D, F, isz, wsz, budget, row_cap)
    else:
        auto_tm = auto_tf = None
    tm = row_cap if tile_rows is not None else auto_tm
    tf = int(tile_f) if tile_f is not None else auto_tf
    assert tf == F or tf % 128 == 0, \
        "tile_f must equal dim_feedforward or be a multiple of 128"

    F_pad = F if tf == F else _round_up(F, tf)
    rows_p = _round_up(rows, tm)

    x2 = x.reshape(rows, D)
    if rows_p != rows:
        x2 = jnp.pad(x2, ((0, rows_p - rows), (0, 0)))

    if F_pad != F:
        # Zero hidden columns are exact: relu(0 + 0) = 0 and the matching W2
        # rows are zero, so padded columns contribute nothing.
        w1 = jnp.pad(w1, ((0, 0), (0, F_pad - F)))
        b1 = jnp.pad(b1, ((0, F_pad - F),))
        w2 = jnp.pad(w2, ((0, F_pad - F), (0, 0)))

    b1_2 = b1.reshape(1, F_pad)
    b2_2 = b2.reshape(1, D)
    gamma_2 = gamma.reshape(1, D)
    beta_2 = beta.reshape(1, D)

    grid = (rows_p // tm, F_pad // tf)
    k_steps = grid[1]

    weight_bytes = (2 * D * F_pad + F_pad + 3 * D) * wsz
    cost = pl.CostEstimate(
        flops=int(4 * rows_p * D * F_pad),
        transcendentals=int(rows_p),
        bytes_accessed=int(2 * rows_p * D * isz
                           + (1 if k_steps == 1 else grid[0]) * weight_bytes),
    )

    out2 = pl.pallas_call(
        ffn_block_kernel,
        out_shape=jax.ShapeDtypeStruct((rows_p, D), x.dtype),
        grid_spec=pltpu.PrefetchScalarGridSpec(
            num_scalar_prefetch=0,
            grid=grid,
            in_specs=[
                pl.BlockSpec((tm, D), lambda i, k: (i, 0)),     # x tile
                pl.BlockSpec((D, tf), lambda i, k: (0, k)),     # W1 slice
                pl.BlockSpec((1, tf), lambda i, k: (0, k)),     # b1 slice
                pl.BlockSpec((tf, D), lambda i, k: (k, 0)),     # W2 slice
                pl.BlockSpec((1, D), lambda i, k: (0, 0)),      # b2
                pl.BlockSpec((1, D), lambda i, k: (0, 0)),      # gamma
                pl.BlockSpec((1, D), lambda i, k: (0, 0)),      # beta
            ],
            out_specs=pl.BlockSpec((tm, D), lambda i, k: (i, 0)),
            scratch_shapes=[pltpu.VMEM((tm, D), jnp.float32)],
        ),
        compiler_params=pltpu.CompilerParams(
            dimension_semantics=("parallel", "arbitrary"),
            vmem_limit_bytes=int(budget),
        ),
        cost_estimate=cost,
    )(x2, w1, b1_2, w2, b2_2, gamma_2, beta_2)

    if rows_p != rows:
        out2 = out2[:rows]
    return out2.reshape(B, S, D)


def _reference(x, w1, b1, w2, b2, gamma, beta):
    xf = x.astype(jnp.float32)
    h = jnp.maximum(xf @ w1.astype(jnp.float32) + b1.astype(jnp.float32), 0.0)
    y = h @ w2.astype(jnp.float32) + b2.astype(jnp.float32)
    z = xf + y
    mean = jnp.mean(z, axis=-1, keepdims=True)
    var = jnp.mean((z - mean) ** 2, axis=-1, keepdims=True)
    out = (z - mean) / jnp.sqrt(var + 1e-5) * gamma.astype(jnp.float32) \
          + beta.astype(jnp.float32)
    return out.astype(x.dtype)


if __name__ == "__main__":
    def make_case(key, B, S, D, F, dtype=jnp.float32):
        k = jax.random.split(key, 5)
        x = jax.random.normal(k[0], (B, S, D), dtype=dtype)
        w1 = (jax.random.uniform(k[1], (D, F), jnp.float32, -1.0, 1.0)
              / jnp.sqrt(D)).astype(dtype)
        b1 = (jax.random.uniform(k[2], (F,), jnp.float32, -1.0, 1.0)
              / jnp.sqrt(D)).astype(dtype)
        w2 = (jax.random.uniform(k[3], (F, D), jnp.float32, -1.0, 1.0)
              / jnp.sqrt(F)).astype(dtype)
        b2 = (jax.random.uniform(k[4], (D,), jnp.float32, -1.0, 1.0)
              / jnp.sqrt(F)).astype(dtype)
        gamma = jnp.ones((D,), dtype)
        beta = jnp.zeros((D,), dtype)
        return x, w1, b1, w2, b2, gamma, beta

    # Case 1: baseline small shape (batch=2, seq=8, d_model=32, ffn=64);
    # auto tiling -> weights-resident path, single grid step.
    args1 = make_case(jax.random.PRNGKey(0), 2, 8, 32, 64)
    out1 = jax.block_until_ready(feed_forward_block(*args1))
    assert out1.shape == (2, 8, 32)
    assert jnp.allclose(out1, _reference(*args1), atol=1e-4, rtol=1e-4), \
        "case1 mismatch vs reference"

    # Case 2: ragged row count (B*S not a multiple of 8) -> row-pad path.
    args2 = make_case(jax.random.PRNGKey(1), 3, 5, 32, 64)
    out2 = jax.block_until_ready(feed_forward_block(*args2))
    assert out2.shape == (3, 5, 32)
    assert jnp.allclose(out2, _reference(*args2), atol=1e-4, rtol=1e-4), \
        "case2 mismatch vs reference"

    # Case 3: multi-tile grid on both axes (3 row tiles x 2 reduction steps)
    # exercising the streamed-accumulator path.
    args3 = make_case(jax.random.PRNGKey(2), 2, 24, 128, 256)
    out3 = jax.block_until_ready(
        feed_forward_block(*args3, tile_rows=16, tile_f=128))
    assert out3.shape == (2, 24, 128)
    assert jnp.allclose(out3, _reference(*args3), atol=1e-4, rtol=1e-4), \
        "case3 mismatch vs reference"

    # Case 4: hidden dim F=192 not divisible by the 128 tile -> zero-padded
    # hidden columns (exactness of the F-padding path).
    args4 = make_case(jax.random.PRNGKey(3), 2, 24, 128, 192)
    out4 = jax.block_until_ready(
        feed_forward_block(*args4, tile_rows=16, tile_f=128))
    assert out4.shape == (2, 24, 128)
    assert jnp.allclose(out4, _reference(*args4), atol=1e-4, rtol=1e-4), \
        "case4 mismatch vs reference"

    print("KERNEL_OK")
</pallas_src>

<mosaic_0001>
module attributes {stable_mosaic.version = 11 : i64} {
  func.func @ffn_block_kernel(%arg0: i32, %arg1: i32, %arg2: memref<16x32xf32, #tpu.memory_space<vmem>>, %arg3: memref<32x64xf32, #tpu.memory_space<vmem>>, %arg4: memref<1x64xf32, #tpu.memory_space<vmem>>, %arg5: memref<64x32xf32, #tpu.memory_space<vmem>>, %arg6: memref<1x32xf32, #tpu.memory_space<vmem>>, %arg7: memref<1x32xf32, #tpu.memory_space<vmem>>, %arg8: memref<1x32xf32, #tpu.memory_space<vmem>>, %arg9: memref<16x32xf32, #tpu.memory_space<vmem>>, %arg10: memref<16x32xf32, #tpu.memory_space<vmem>>) attributes {dimension_semantics = [#tpu.dimension_semantics<parallel>, #tpu.dimension_semantics<arbitrary>], iteration_bounds = array<i64: 1, 1>, scalar_prefetch = 0 : i64, scratch_operands = 1 : i64, tpu.core_type = #tpu.core_type<tc>, window_params = [{transform_indices = @transform_0, window_bounds = array<i64: 16, 32>}, {transform_indices = @transform_1, window_bounds = array<i64: 32, 64>}, {transform_indices = @transform_2, window_bounds = array<i64: 1, 64>}, {transform_indices = @transform_3, window_bounds = array<i64: 64, 32>}, {pipeline_mode = #tpu.pipeline_mode<synchronous>, transform_indices = @transform_4, window_bounds = array<i64: 1, 32>}, {pipeline_mode = #tpu.pipeline_mode<synchronous>, transform_indices = @transform_5, window_bounds = array<i64: 1, 32>}, {pipeline_mode = #tpu.pipeline_mode<synchronous>, transform_indices = @transform_6, window_bounds = array<i64: 1, 32>}, {transform_indices = @transform_7, window_bounds = array<i64: 16, 32>}]} {
    %c0_i32 = arith.constant 0 : i32
    %0 = arith.cmpi eq, %arg1, %c0_i32 : i32
    %1 = arith.extui %0 : i1 to i32
    %c0_i32_0 = arith.constant 0 : i32
    %2 = arith.cmpi ne, %1, %c0_i32_0 : i32
    scf.if %2 {
      %cst_16 = arith.constant 0.000000e+00 : f32
      %19 = vector.broadcast %cst_16 : f32 to vector<16x32xf32>
      %c0_17 = arith.constant 0 : index
      %c0_18 = arith.constant 0 : index
      %20 = vector.load %arg10[%c0_17, %c0_18] : memref<16x32xf32, #tpu.memory_space<vmem>>, vector<16x32xf32>
      tpu.vector_store %arg10[%c0_17, %c0_18], %19 {strides = array<i32>} : memref<16x32xf32, #tpu.memory_space<vmem>>, vector<16x32xf32>,
    } else {
    }
    %c0 = arith.constant 0 : index
    %c0_1 = arith.constant 0 : index
    %3 = vector.load %arg2[%c0, %c0_1] : memref<16x32xf32, #tpu.memory_space<vmem>>, vector<16x32xf32>
    %c0_2 = arith.constant 0 : index
    %c0_3 = arith.constant 0 : index
    %4 = vector.load %arg3[%c0_2, %c0_3] : memref<32x64xf32, #tpu.memory_space<vmem>>, vector<32x64xf32>
    %cst = arith.constant dense<0.000000e+00> : vector<16x64xf32>
    %5 = tpu.matmul %3, %4, %cst {dimension_numbers = #tpu.dot_dimension_numbers<[1], [0], [0], [1], [0, 0, 1, 1], [], []>} : vector<16x32xf32>, vector<32x64xf32>, vector<16x64xf32> -> vector<16x64xf32>
    %c0_4 = arith.constant 0 : index
    %c0_5 = arith.constant 0 : index
    %6 = vector.load %arg4[%c0_4, %c0_5] : memref<1x64xf32, #tpu.memory_space<vmem>>, vector<1x64xf32>
    %7 = vector.broadcast %6 : vector<1x64xf32> to vector<16x64xf32>
    %8 = arith.addf %5, %7 : vector<16x64xf32>
    %cst_6 = arith.constant 0.000000e+00 : f32
    %9 = vector.broadcast %cst_6 : f32 to vector<16x64xf32>
    %10 = arith.maximumf %8, %9 : vector<16x64xf32>
    %c0_7 = arith.constant 0 : index
    %c0_8 = arith.constant 0 : index
    %11 = vector.load %arg10[%c0_7, %c0_8] : memref<16x32xf32, #tpu.memory_space<vmem>>, vector<16x32xf32>
    %c0_9 = arith.constant 0 : index
    %c0_10 = arith.constant 0 : index
    %12 = vector.load %arg5[%c0_9, %c0_10] : memref<64x32xf32, #tpu.memory_space<vmem>>, vector<64x32xf32>
    %cst_11 = arith.constant dense<0.000000e+00> : vector<16x32xf32>
    %13 = tpu.matmul %10, %12, %cst_11 {dimension_numbers = #tpu.dot_dimension_numbers<[1], [0], [0], [1], [0, 0, 1, 1], [], []>} : vector<16x64xf32>, vector<64x32xf32>, vector<16x32xf32> -> vector<16x32xf32>
    %14 = arith.addf %11, %13 : vector<16x32xf32>
    %c0_12 = arith.constant 0 : index
    %c0_13 = arith.constant 0 : index
    %15 = vector.load %arg10[%c0_12, %c0_13] : memref<16x32xf32, #tpu.memory_space<vmem>>, vector<16x32xf32>
    tpu.vector_store %arg10[%c0_12, %c0_13], %14 {strides = array<i32>} : memref<16x32xf32, #tpu.memory_space<vmem>>, vector<16x32xf32>,
    %c0_i32_14 = arith.constant 0 : i32
    %16 = arith.cmpi eq, %arg1, %c0_i32_14 : i32
    %17 = arith.extui %16 : i1 to i32
    %c0_i32_15 = arith.constant 0 : i32
    %18 = arith.cmpi ne, %17, %c0_i32_15 : i32
    scf.if %18 {
      %c0_16 = arith.constant 0 : index
      %c0_17 = arith.constant 0 : index
      %19 = vector.load %arg10[%c0_16, %c0_17] : memref<16x32xf32, #tpu.memory_space<vmem>>, vector<16x32xf32>
      %c0_18 = arith.constant 0 : index
      %c0_19 = arith.constant 0 : index
      %20 = vector.load %arg6[%c0_18, %c0_19] : memref<1x32xf32, #tpu.memory_space<vmem>>, vector<1x32xf32>
      %21 = vector.broadcast %20 : vector<1x32xf32> to vector<16x32xf32>
      %22 = arith.addf %19, %21 : vector<16x32xf32>
      %23 = arith.addf %3, %22 : vector<16x32xf32>
      %cst_20 = arith.constant dense<0.000000e+00> : vector<16xf32>
      %24 = vector.multi_reduction <add>, %23, %cst_20 [1] : vector<16x32xf32> to vector<16xf32>
      %25 = vector.shape_cast %24 : vector<16xf32> to vector<16x1xf32>
      %cst_21 = arith.constant 3.125000e-02 : f32
      %26 = vector.broadcast %cst_21 : f32 to vector<16x1xf32>
      %27 = arith.mulf %25, %26 : vector<16x1xf32>
      %28 = arith.mulf %23, %23 : vector<16x32xf32>
      %cst_22 = arith.constant dense<0.000000e+00> : vector<16xf32>
      %29 = vector.multi_reduction <add>, %28, %cst_22 [1] : vector<16x32xf32> to vector<16xf32>
      %30 = vector.shape_cast %29 : vector<16xf32> to vector<16x1xf32>
      %cst_23 = arith.constant 3.125000e-02 : f32
      %31 = vector.broadcast %cst_23 : f32 to vector<16x1xf32>
      %32 = arith.mulf %30, %31 : vector<16x1xf32>
      %33 = arith.mulf %27, %27 : vector<16x1xf32>
      %34 = arith.subf %32, %33 : vector<16x1xf32>
      %cst_24 = arith.constant 0.000000e+00 : f32
      %35 = vector.broadcast %cst_24 : f32 to vector<16x1xf32>
      %36 = arith.maximumf %34, %35 : vector<16x1xf32>
      %cst_25 = arith.constant 9.99999974E-6 : f32
      %37 = vector.broadcast %cst_25 : f32 to vector<16x1xf32>
      %38 = arith.addf %36, %37 : vector<16x1xf32>
      %39 = math.rsqrt %38 : vector<16x1xf32>
      %40 = vector.broadcast %27 : vector<16x1xf32> to vector<16x32xf32>
      %41 = arith.subf %23, %40 : vector<16x32xf32>
      %42 = vector.broadcast %39 : vector<16x1xf32> to vector<16x32xf32>
      %43 = arith.mulf %41, %42 : vector<16x32xf32>
      %c0_26 = arith.constant 0 : index
      %c0_27 = arith.constant 0 : index
      %44 = vector.load %arg7[%c0_26, %c0_27] : memref<1x32xf32, #tpu.memory_space<vmem>>, vector<1x32xf32>
      %45 = vector.broadcast %44 : vector<1x32xf32> to vector<16x32xf32>
      %46 = arith.mulf %43, %45 : vector<16x32xf32>
      %c0_28 = arith.constant 0 : index
      %c0_29 = arith.constant 0 : index
      %47 = vector.load %arg8[%c0_28, %c0_29] : memref<1x32xf32, #tpu.memory_space<vmem>>, vector<1x32xf32>
      %48 = vector.broadcast %47 : vector<1x32xf32> to vector<16x32xf32>
      %49 = arith.addf %46, %48 : vector<16x32xf32>
      %c0_30 = arith.constant 0 : index
      %c0_31 = arith.constant 0 : index
      %50 = vector.load %arg9[%c0_30, %c0_31] : memref<16x32xf32, #tpu.memory_space<vmem>>, vector<16x32xf32>
      tpu.vector_store %arg9[%c0_30, %c0_31], %49 {strides = array<i32>} : memref<16x32xf32, #tpu.memory_space<vmem>>, vector<16x32xf32>,
    } else {
    }
    return
  }
  func.func @transform_0(%arg0: i32, %arg1: i32) -> (i32, i32) {
    %c0_i32 = arith.constant 0 : i32
    %c0_i32_0 = arith.constant 0 : i32
    return %arg0, %c0_i32 : i32, i32
  }
  func.func @transform_1(%arg0: i32, %arg1: i32) -> (i32, i32) {
    %c0_i32 = arith.constant 0 : i32
    %c0_i32_0 = arith.constant 0 : i32
    return %c0_i32, %arg1 : i32, i32
  }
  func.func @transform_2(%arg0: i32, %arg1: i32) -> (i32, i32) {
    %c0_i32 = arith.constant 0 : i32
    %c0_i32_0 = arith.constant 0 : i32
    return %c0_i32, %arg1 : i32, i32
  }
  func.func @transform_3(%arg0: i32, %arg1: i32) -> (i32, i32) {
    %c0_i32 = arith.constant 0 : i32
    %c0_i32_0 = arith.constant 0 : i32
    return %arg1, %c0_i32 : i32, i32
  }
  func.func @transform_4(%arg0: i32, %arg1: i32) -> (i32, i32) {
    %c0_i32 = arith.constant 0 : i32
    %c0_i32_0 = arith.constant 0 : i32
    %c0_i32_1 = arith.constant 0 : i32
    return %c0_i32, %c0_i32_0 : i32, i32
  }
  func.func @transform_5(%arg0: i32, %arg1: i32) -> (i32, i32) {
    %c0_i32 = arith.constant 0 : i32
    %c0_i32_0 = arith.constant 0 : i32
    %c0_i32_1 = arith.constant 0 : i32
    return %c0_i32, %c0_i32_0 : i32, i32
  }
  func.func @transform_6(%arg0: i32, %arg1: i32) -> (i32, i32) {
    %c0_i32 = arith.constant 0 : i32
    %c0_i32_0 = arith.constant 0 : i32
    %c0_i32_1 = arith.constant 0 : i32
    return %c0_i32, %c0_i32_0 : i32, i32
  }
  func.func @transform_7(%arg0: i32, %arg1: i32) -> (i32, i32) {
    %c0_i32 = arith.constant 0 : i32
    %c0_i32_0 = arith.constant 0 : i32
    return %arg0, %c0_i32 : i32, i32
  }
}

</mosaic_0001>

<bundles_post_ra>
// kernel: tpu_custom_call.1
= control target key start
LH: loop header
LB: loop body
LE: loop exit
PB: predicated region body
PF: predicated region fallthrough
CT: control target
= control target key end

     0   :  { %vm31_vm0 = vcmask 261120   ;;  %s382_s0 = inlined_call_operand.vmem [shape: f32[16,32], index: 0, kind: input, shape index: {}]   ;;  %s383_s1 = inlined_call_operand.vmem [shape: f32[32,64], index: 1, kind: input, shape index: {}]   ;;  %s384_s2 = inlined_call_operand.vmem [shape: f32[1,64], index: 2, kind: input, shape index: {}]   ;;  %s385_s3 = inlined_call_operand.vmem [shape: f32[64,32], index: 3, kind: input, shape index: {}]   ;;  %s386_s4 = inlined_call_operand.vmem [shape: f32[1,32], index: 4, kind: input, shape index: {}]   ;;  %s387_s5 = inlined_call_operand.vmem [shape: f32[1,32], index: 5, kind: input, shape index: {}]   ;;  %s388_s6 = inlined_call_operand.vmem [shape: f32[1,32], index: 6, kind: input, shape index: {}]   ;;  %s389_s7 = inlined_call_operand.hbm [shape: f32[16,32], index: 7, kind: output, shape index: {}]  }
   0x1   :  { %v39_v0 = vld [vmem:[%s383_s1 + $0x18] sm:$0xff]  ;;  %v38_v1 = vld [vmem:[%s383_s1 + $0x10] sm:$0xff]  ;;  %v37_v2 = vld [vmem:[%s383_s1 + $0x8] sm:$0xff] }
   0x2   :  { %63 = vmatpush.msra.mxu0 %v39_v0  ;;  %219 = vmatpush.msra.mxu3 %v39_v0  ;;  %v85_v3 = vld [vmem:[%s385_s3 + $0x38] sm:$0xff]  ;;  %v36_v4 = vld [vmem:[%s383_s1] sm:$0xff]  ;;  %v84_v5 = vld [vmem:[%s385_s3 + $0x30] sm:$0xff] }
   0x3   :  { %v34_v6 = vld [vmem:[%s382_s0] sm:$0xff]  ;;  %101 = vmatpush.msra.mxu1 %v85_v3  ;;  %223 = vmatpush.msra.mxu2 %v85_v3  ;;  %v35_v7 = vld [vmem:[%s382_s0 + $0x8] sm:$0xff] }
   0x4   :  { %64 = vmatpush.msra.mxu0 %v38_v1  ;;  %220 = vmatpush.msra.mxu3 %v38_v1 }
   0x6   :  { %65 = vmatpush.msra.mxu0 %v37_v2  ;;  %221 = vmatpush.msra.mxu3 %v37_v2 }
   0x7   :  { %12 = vsyncpa [#allocation4], 0  ;;  %102 = vmatpush.msra.mxu1 %v84_v5  ;;  %v83_v8 = vld [vmem:[%s385_s3 + $0x28] sm:$0xff]  ;;  %224 = vmatpush.msra.mxu2 %v84_v5  ;;  %v82_v9 = vld [vmem:[%s385_s3 + $0x20] sm:$0xff]  ;;  %v269_v14 = vmov 0.0   ;;  %vm86_vm1 = vcmask 523264  }
   0x8   :  { %66 = vmatpush.msra.mxu0 %v36_v4  ;;  %222 = vmatpush.msra.mxu3 %v36_v4  ;;  %v81_v10 = vld [vmem:[%s385_s3 + $0x18] sm:$0xff]  ;;  %v80_v11 = vld [vmem:[%s385_s3 + $0x10] sm:$0xff]  ;;  %v79_v12 = vld [vmem:[%s385_s3 + $0x8] sm:$0xff]  ;;  %32 = vst.msk [vmem:[#allocation2] sm:$0xff] %vm31_vm0, %v269_v14  ;;  %s271_s12 = smov 128   ;;  %s272_s13 = smov 8  }
   0x9   :  { %215 = vmatmul.msk.f32.vlgmr.msra.gmra.mxu0 %vm31_vm0, %v34_v6  ;;  %216 = vmatmul.msk.f32.vlgmr.msra.gmra.mxu3 %vm31_vm0, %v35_v7  ;;  %v78_v13 = vld [vmem:[%s385_s3] sm:$0xff]  ;;  %33 = vst.msk [vmem:[#allocation2 + $0x8] sm:$0xff] %vm31_vm0, %v269_v14 }
   0xa   :  { %103 = vmatpush.msra.mxu1 %v83_v8  ;;  %225 = vmatpush.msra.mxu2 %v83_v8  ;;  %v235_v15 = vld [vmem:[%s384_s2] ss:$0 sm:$0xff] }
   0xb   :  { %v236_v25 = vld [vmem:[%s386_s4] ss:$0 sm:$0xff] }
   0xc   :  { %104 = vmatpush.msra.mxu1 %v82_v9  ;;  %226 = vmatpush.msra.mxu2 %v82_v9  ;;  %v237_v0 = vld [vmem:[%s387_s5] ss:$0 sm:$0xff]  ;;  %s270_s5 = smov [#allocation3]  }
   0xd   :  { %v238_v4 = vld [vmem:[%s388_s6] ss:$0 sm:$0xff]  ;;  %s201_s9 = sshll.u32 %s270_s5, 4  ;;  %s203_s6 = sshll.u32 %s389_s7, 4  ;;  %s202_s9 = int_to_ptr.vmem [resolvable:$true] %s201_s9  ;;  %s204_s6 = int_to_ptr.hbm [resolvable:$true] %s203_s6 }
   0xe   :  { %105 = vmatpush.msra.mxu1 %v81_v10  ;;  %227 = vmatpush.msra.mxu2 %v81_v10 }
   0xf   :  { %v76_v22 = vld [vmem:[#allocation2] sm:$0xff] }
  0x10   :  { %106 = vmatpush.msra.mxu1 %v80_v11  ;;  %228 = vmatpush.msra.mxu2 %v80_v11  ;;  %v77_v26 = vld [vmem:[#allocation2 + $0x8] sm:$0xff] }
  0x12   :  { %107 = vmatpush.msra.mxu1 %v79_v12  ;;  %229 = vmatpush.msra.mxu2 %v79_v12 }
  0x14   :  { %108 = vmatpush.msra.mxu1 %v78_v13  ;;  %230 = vmatpush.msra.mxu2 %v78_v13 }
  0x86   :  { %v68_v16 = vpop.f32.mrf.mxu0 }
  0x87   :  { %v69_v17 = vadd.f32 %v235_v15, %v68_v16 }
  0x89   :  { %v74_v18 = vmax.f32 %v69_v17, 0.0 }
  0x8b   :  { %217 = vmatmul.msk.f32.vlgmr.msra.gmra.mxu1 %vm86_vm1, %v74_v18 }
  0x8c   :  { %v71_v19 = vpop.f32.mrf.mxu3 }
  0x8d   :  { %v72_v20 = vadd.f32 %v235_v15, %v71_v19 }
  0x8f   :  { %v75_v21 = vmax.f32 %v72_v20, 0.0 }
  0x91   :  { %218 = vmatmul.msk.f32.vlgmr.msra.gmra.mxu2 %vm86_vm1, %v75_v21 }
 0x108   :  { %v110_v23 = vpop.f32.mrf.mxu1 }
 0x109   :  { %v116_v24 = vadd.f32 %v110_v23, %v76_v22 }
 0x10b   :  { %118 = vst.msk [vmem:[#allocation2] sm:$0xff] %vm31_vm0, %v116_v24 }
 0x112   :  { %v123_v27 = vld [vmem:[#allocation2] sm:$0xff] }
 0x113   :  { %v129_v28 = vadd.f32 %v236_v25, %v123_v27 }
 0x114   :  { %v113_v29 = vpop.f32.mrf.mxu2 }
 0x115   :  { %v117_v30 = vadd.f32 %v113_v29, %v77_v26  ;;  %v131_v31 = vadd.f32 %v129_v28, %v34_v6 }
 0x117   :  { %119 = vst.msk [vmem:[#allocation2 + $0x8] sm:$0xff] %vm31_vm0, %v117_v30  ;;  %v133_v32 = vsel %vm31_vm0, %v131_v31, 0.0  ;;  %v141_v33 = vmul.f32 %v131_v31, %v131_v31 }
 0x118   :  { %134 = vadd.xlane.f32.xlu0 %v133_v32 }
 0x119   :  { %v143_v34 = vsel %vm31_vm0, %v141_v33, 0.0 }
 0x11a   :  { %144 = vadd.xlane.f32.xlu1 %v143_v34 }
 0x11e   :  { %v124_v35 = vld [vmem:[#allocation2 + $0x8] sm:$0xff] }
 0x11f   :  { %v130_v36 = vadd.f32 %v236_v25, %v124_v35 }
 0x121   :  { %v132_v37 = vadd.f32 %v130_v36, %v35_v7 }
 0x123   :  { %v136_v38 = vsel %vm31_vm0, %v132_v37, 0.0  ;;  %v142_v39 = vmul.f32 %v132_v37, %v132_v37 }
 0x124   :  { %137 = vadd.xlane.f32.xlu0 %v136_v38 }
 0x125   :  { %v146_v40 = vsel %vm31_vm0, %v142_v39, 0.0 }
 0x126   :  { %147 = vadd.xlane.f32.xlu1 %v146_v40 }
 0x18b   :  { %v135_v41 = vpop.xlane.xlu0 %134 }
 0x18c   :  { %v139_v42 = vmul.f32 0.03125, %v135_v41 }
 0x18d   :  { %v145_v43 = vpop.xlane.xlu1 %144 }
 0x18e   :  { %v151_v44 = vmul.f32 %v139_v42, %v139_v42  ;;  %v149_v45 = vmul.f32 0.03125, %v145_v43  ;;  %v179_v63 = vsub.f32 %v131_v31, %v139_v42 }
 0x190   :  { %v153_v46 = vsub.f32 %v149_v45, %v151_v44 }
 0x192   :  { %v155_v47 = vmax.f32 %v153_v46, 0.0 }
 0x194   :  { %v157_v48 = vadd.f32 1e-05, %v155_v47 }
 0x196   :  { %239 = vrsqrt.f32 %v157_v48  ;;  %vm165_vm3 = vweird.f32 %v157_v48 }
 0x197   :  { %v138_v49 = vpop.xlane.xlu0 %137 }
 0x198   :  { %v140_v50 = vmul.f32 0.03125, %v138_v49 }
 0x199   :  { %v148_v51 = vpop.xlane.xlu1 %147 }
 0x19a   :  { %v152_v52 = vmul.f32 %v140_v50, %v140_v50  ;;  %v150_v53 = vmul.f32 0.03125, %v148_v51  ;;  %v180_v12 = vsub.f32 %v132_v37, %v140_v50 }
 0x19c   :  { %v240_v54 = vpop.eup %239  ;;  %v154_v55 = vsub.f32 %v150_v53, %v152_v52 }
 0x19d   :  { %v160_v56 = vmul.f32 %v240_v54, %v157_v48  ;;  %vm166_vm2 = vweird.f32 %v240_v54 }
 0x19e   :  { %v156_v57 = vmax.f32 %v154_v55, 0.0  ;;  %vm167_vm4 = vmor %vm165_vm3, %vm166_vm2 }
 0x19f   :  { %v161_v58 = vmul.f32 %v240_v54, %v160_v56 }
 0x1a0   :  { %v158_v59 = vadd.f32 1e-05, %v156_v57 }
 0x1a1   :  { %v162_v60 = vmul.f32 0.5, %v161_v58 }
 0x1a2   :  { %241 = vrsqrt.f32 %v158_v59  ;;  %vm175_vm6 = vweird.f32 %v158_v59 }
 0x1a3   :  { %v163_v61 = vsub.f32 1.5, %v162_v60 }
 0x1a5   :  { %v164_v62 = vmul.f32 %v240_v54, %v163_v61 }
 0x1a7   :  { %v168_v1 = vsel %vm167_vm4, %v240_v54, %v164_v62 }
 0x1a8   :  { %v242_v2 = vpop.eup %241  ;;  %v181_v3 = vmul.f32 %v179_v63, %v168_v1 }
 0x1a9   :  { %v170_v5 = vmul.f32 %v242_v2, %v158_v59  ;;  %vm176_vm5 = vweird.f32 %v242_v2 }
 0x1aa   :  { %v187_v6 = vmul.f32 %v237_v0, %v181_v3  ;;  %vm177_vm7 = vmor %vm175_vm6, %vm176_vm5 }
 0x1ab   :  { %v171_v7 = vmul.f32 %v242_v2, %v170_v5 }
 0x1ac   :  { %v193_v8 = vadd.f32 %v238_v4, %v187_v6 }
 0x1ad   :  { %v172_v9 = vmul.f32 0.5, %v171_v7 }
 0x1ae   :  { %195 = vst.msk [vmem:[#allocation3] sm:$0xff] %vm31_vm0, %v193_v8 }
 0x1af   :  { %v173_v10 = vsub.f32 1.5, %v172_v9 }
 0x1b1   :  { %v174_v11 = vmul.f32 %v242_v2, %v173_v10 }
 0x1b3   :  { %v178_v13 = vsel %vm177_vm7, %v242_v2, %v174_v11 }
 0x1b4   :  { %v182_v14 = vmul.f32 %v180_v12, %v178_v13 }
 0x1b6   :  { %v188_v15 = vmul.f32 %v237_v0, %v182_v14 }
 0x1b8   :  { %v194_v16 = vadd.f32 %v238_v4, %v188_v15 }
 0x1ba   :  { %196 = vst.msk [vmem:[#allocation3 + $0x8] sm:$0xff] %vm31_vm0, %v194_v16 }
 0x1bb   :  { %209 = dma.vmem_to_hbm [thread:$0]  %s202_s9, 256, %s204_s6, [#allocation4], %s271_s12, %s271_s12, %s272_s13  }
 0x1bc   :  { %267 = dma.done.wait [#allocation4], 256  }
 0x1bd   :  { %268 = vsyncadd [#allocation4], 4294967040 }
 0x1be   :  { %214 = vsyncpa [#allocation4], 1 }

</bundles_post_ra>
